<compile_context>
chip_gen: v7x
topology: tpu7x:2x2x1
jax: 0.10.0
libtpu: 0.0.40
codegen_flags: <defaults>
</compile_context>

<pallas_src>
import functools

import jax
import jax.numpy as jnp
from jax.experimental import pallas as pl
from jax.experimental.pallas import tpu as pltpu


def _round_up(x, m):
    return (x + m - 1) // m * m


def _gcn_flat_res_kernel(x_ref, adj_ref, w_ref, b_ref, o_ref, h_ref, s_ref,
                         *, n_layers, tm):
    """Grid = (layer, row_panel).  Layer 0 = ingc, 1..L = residual, L+1 = out."""
    l = pl.program_id(0)
    p = pl.program_id(1)
    last = n_layers - 1

    # --- one-time init: the running hidden state starts as the padded x ----
    @pl.when((l == 0) & (p == 0))
    def _():
        h_ref[...] = x_ref[...]

    # --- once per layer: s = h @ W_l (small matmul, result kept in VMEM) ---
    @pl.when(p == 0)
    def _():
        s_ref[...] = jnp.dot(h_ref[...].astype(jnp.bfloat16), w_ref[...],
                             preferred_element_type=jnp.float32
                             ).astype(jnp.bfloat16)

    # --- per row panel: z = adj[panel] @ s + b  (MXU bf16, f32 accum) ------
    z = jnp.dot(adj_ref[...], s_ref[...],
                preferred_element_type=jnp.float32) + b_ref[...]

    rows = pl.ds(pl.multiple_of(p * tm, tm), tm)

    @pl.when(l == 0)
    def _():                      # ingc: relu, no residual (dropout = eval id)
        h_ref[rows, :] = jnp.maximum(z, 0.0)

    @pl.when((l > 0) & (l < last))
    def _():                      # hidden residual GCN layers
        h_ref[rows, :] = jnp.maximum(z, 0.0) + h_ref[rows, :]

    @pl.when(l == last)
    def _():                      # output layer + fused log_softmax(dim=1)
        # Padded class lanes already carry -1e30 via b_out, so no masking here.
        m = jnp.max(z, axis=1, keepdims=True)
        zz = z - m
        lse = jnp.log(jnp.sum(jnp.exp(zz), axis=1, keepdims=True))
        o_ref[rows, :] = (zz - lse).astype(o_ref.dtype)


def gcn_flat_res_forward(params, x, adj, *, tm=128):
    """Fused forward: log_softmax(GCFlatResBlock(relu(GCN(x, adj)), adj))."""
    assert tm % 128 == 0, "row-panel height must keep adj lane-dense"
    n, nfeat = x.shape
    nhid = params["w_in"].shape[1]
    nclass = params["w_out"].shape[1]
    nres = int(params["w_res"].shape[0])
    n_layers = nres + 2

    # Lane-dense padding: all feature dims share one padded width D so the
    # per-layer weights stack into one (L+2, D, D) tensor indexed by the layer
    # grid axis.  (If nfeat >> nhid, split the input layer out instead.)
    d_pad = max(_round_up(nfeat, 128), _round_up(nhid, 128),
                _round_up(nclass, 128))
    n_pad = _round_up(n, tm)

    f32, bf16 = jnp.float32, jnp.bfloat16

    # Zero padding is exact: adj's padded columns are zero, so padded rows of
    # h/s never contaminate real rows, and padded hidden lanes stay zero.
    adj_p = jnp.zeros((n_pad, n_pad), bf16).at[:n, :n].set(adj.astype(bf16))
    x_p = jnp.zeros((n_pad, d_pad), f32).at[:n, :nfeat].set(x.astype(f32))

    w = jnp.zeros((n_layers, d_pad, d_pad), bf16)
    w = w.at[0, :nfeat, :nhid].set(params["w_in"].astype(bf16))
    if nres > 0:
        w = w.at[1:1 + nres, :nhid, :nhid].set(params["w_res"].astype(bf16))
    w = w.at[n_layers - 1, :nhid, :nclass].set(params["w_out"].astype(bf16))

    b = jnp.zeros((n_layers, 1, d_pad), f32)
    b = b.at[0, 0, :nhid].set(params["b_in"].astype(f32))
    if nres > 0:
        b = b.at[1:1 + nres, 0, :nhid].set(params["b_res"].astype(f32))
    # Class mask folded into the output bias: padded class lanes get -1e30
    # (padded W_out columns are zero, so z_pad == b_pad) -> they vanish from
    # the fused log_softmax with no in-kernel iota/where.
    b_out = jnp.full((d_pad,), -1e30, f32).at[:nclass].set(
        params["b_out"].astype(f32))
    b = b.at[n_layers - 1, 0, :].set(b_out)

    grid = (n_layers, n_pad // tm)
    kernel = functools.partial(_gcn_flat_res_kernel,
                               n_layers=n_layers, tm=tm)

    in_specs = [
        pl.BlockSpec((n_pad, d_pad), lambda l, p: (0, 0)),           # x (resident)
        pl.BlockSpec((tm, n_pad), lambda l, p: (p, 0)),              # adj row panel
        pl.BlockSpec((None, d_pad, d_pad), lambda l, p: (l, 0, 0)),  # W_l
        pl.BlockSpec((None, 1, d_pad), lambda l, p: (l, 0, 0)),      # b_l
    ]
    out_specs = pl.BlockSpec((n_pad, d_pad), lambda l, p: (0, 0))    # resident

    scratch_shapes = [
        pltpu.VMEM((n_pad, d_pad), f32),    # h: running hidden state
        pltpu.VMEM((n_pad, d_pad), bf16),   # s = h @ W_l of the current layer
    ]

    # Advisory cost for XLA scheduling around this single long call.
    flops = int(n_layers * (2 * n_pad * n_pad * d_pad
                            + 2 * n_pad * d_pad * d_pad))
    transcendentals = int(n_pad * (d_pad + 1))
    bytes_accessed = int(n_layers * n_pad * n_pad * 2   # adj streamed per layer
                         + n_pad * d_pad * 4            # x
                         + n_layers * d_pad * d_pad * 2  # weights
                         + n_layers * d_pad * 4          # biases
                         + n_pad * d_pad * 4)            # output

    # Scoped-VMEM budget sized to the real footprint (defaults are 16/32 MiB).
    vmem_bytes = (2 * tm * n_pad * 2          # double-buffered adj panel (bf16)
                  + 2 * n_pad * d_pad * 4     # x block (f32, conservative)
                  + 2 * d_pad * d_pad * 2     # layer weight (bf16)
                  + 2 * 8 * d_pad * 4         # layer bias (sublane-padded f32)
                  + n_pad * d_pad * 4         # resident output block (f32)
                  + n_pad * d_pad * 4         # h scratch (f32)
                  + n_pad * d_pad * 2)        # s scratch (bf16)
    vmem_limit = int(max(2 * vmem_bytes, 16 * 1024 * 1024))
    # TODO(synk): at large N shrink `tm` so the budget stays under ~48 MiB on
    #             v7x (64 MiB physical VMEM) / ~100 MiB on v5e/v6e.

    out = pl.pallas_call(
        kernel,
        out_shape=jax.ShapeDtypeStruct((n_pad, d_pad), f32),
        grid_spec=pltpu.PrefetchScalarGridSpec(
            num_scalar_prefetch=0,
            grid=grid,
            in_specs=in_specs,
            out_specs=out_specs,
            scratch_shapes=scratch_shapes),
        compiler_params=pltpu.CompilerParams(
            dimension_semantics=("arbitrary", "arbitrary"),
            vmem_limit_bytes=vmem_limit),
        cost_estimate=pl.CostEstimate(flops=flops,
                                      transcendentals=transcendentals,
                                      bytes_accessed=bytes_accessed),
    )(x_p, adj_p, w, b)
    return out[:n, :nclass]


def init_params(key, nfeat, nhid, nclass, nreslayer):
    """Deterministic uniform(-1/sqrt(fan_out), 1/sqrt(fan_out)) init."""
    def linear(k, fin, fout):
        stdv = 1.0 / (fout ** 0.5)
        kw, kb = jax.random.split(k)
        w = jax.random.uniform(kw, (fin, fout), jnp.float32, -stdv, stdv)
        bias = jax.random.uniform(kb, (fout,), jnp.float32, -stdv, stdv)
        return w, bias

    keys = jax.random.split(key, nreslayer + 2)
    w_in, b_in = linear(keys[0], nfeat, nhid)
    w_res, b_res = [], []
    for l in range(nreslayer):
        wl, bl = linear(keys[1 + l], nhid, nhid)
        w_res.append(wl)
        b_res.append(bl)
    w_out, b_out = linear(keys[-1], nhid, nclass)
    return dict(w_in=w_in, b_in=b_in,
                w_res=jnp.stack(w_res), b_res=jnp.stack(b_res),
                w_out=w_out, b_out=b_out)


def build_normalized_adj(key, n):
    """Random symmetric graph + self-loops, symmetric normalization."""
    a = (jax.random.uniform(key, (n, n)) < 0.1).astype(jnp.float32)
    a = jnp.maximum(a, a.T)
    a = a + jnp.eye(n, dtype=jnp.float32)
    deg = jnp.sum(a, axis=1)
    d_inv_sqrt = 1.0 / jnp.sqrt(deg)
    return a * d_inv_sqrt[:, None] * d_inv_sqrt[None, :]


def gcn_flat_res_reference(params, x, adj):
    """Pure-JAX f32 reference of the same forward (for sanity checking)."""
    h = jax.nn.relu(adj @ (x @ params["w_in"]) + params["b_in"])
    for l in range(params["w_res"].shape[0]):
        h = jax.nn.relu(adj @ (h @ params["w_res"][l]) + params["b_res"][l]) + h
    z = adj @ (h @ params["w_out"]) + params["b_out"]
    return jax.nn.log_softmax(z, axis=1)


if __name__ == "__main__":
    # Small shapes consistent with the module's forward(input, adj):
    #   N nodes, nfeat input features, nhid hidden, nclass classes.
    N, NFEAT, NHID, NCLASS, NRESLAYER = 64, 32, 32, 8, 2

    key = jax.random.PRNGKey(0)
    k_x, k_adj, k_p = jax.random.split(key, 3)

    x = jax.random.normal(k_x, (N, NFEAT), dtype=jnp.float32)
    adj = build_normalized_adj(k_adj, N)
    params = init_params(k_p, NFEAT, NHID, NCLASS, NRESLAYER)

    out = gcn_flat_res_forward(params, x, adj)
    out = jax.block_until_ready(out)

    assert out.shape == (N, NCLASS)
    assert bool(jnp.all(jnp.isfinite(out)))
    # log_softmax rows must exp-sum to ~1
    row_sums = jnp.sum(jnp.exp(out), axis=1)
    assert bool(jnp.allclose(row_sums, 1.0, atol=1e-3))
    # Loose agreement with the f32 pure-JAX reference (kernel uses bf16 MXU).
    ref = gcn_flat_res_reference(params, x, adj)
    assert bool(jnp.max(jnp.abs(out - ref)) < 0.2)

    print("KERNEL_OK")
</pallas_src>

<mosaic_0001>
module attributes {stable_mosaic.version = 11 : i64} {
  func.func @_gcn_flat_res_kernel(%arg0: i32, %arg1: i32, %arg2: memref<128x128xf32, #tpu.memory_space<vmem>>, %arg3: memref<128x128xbf16, #tpu.memory_space<vmem>>, %arg4: memref<1x128x128xbf16, #tpu.memory_space<vmem>>, %arg5: memref<1x1x128xf32, #tpu.memory_space<vmem>>, %arg6: memref<128x128xf32, #tpu.memory_space<vmem>>, %arg7: memref<128x128xf32, #tpu.memory_space<vmem>>, %arg8: memref<128x128xbf16, #tpu.memory_space<vmem>>) attributes {dimension_semantics = [#tpu.dimension_semantics<arbitrary>, #tpu.dimension_semantics<arbitrary>], iteration_bounds = array<i64: 4, 1>, scalar_prefetch = 0 : i64, scratch_operands = 2 : i64, tpu.core_type = #tpu.core_type<tc>, window_params = [{pipeline_mode = #tpu.pipeline_mode<synchronous>, transform_indices = @transform_0, window_bounds = array<i64: 128, 128>}, {transform_indices = @transform_1, window_bounds = array<i64: 128, 128>}, {transform_indices = @transform_2, window_bounds = array<i64: 1, 128, 128>}, {transform_indices = @transform_3, window_bounds = array<i64: 1, 1, 128>}, {pipeline_mode = #tpu.pipeline_mode<synchronous>, transform_indices = @transform_4, window_bounds = array<i64: 128, 128>}]} {
    %c0_i32 = arith.constant 0 : i32
    %0 = arith.cmpi eq, %arg0, %c0_i32 : i32
    %c0_i32_0 = arith.constant 0 : i32
    %1 = arith.cmpi eq, %arg1, %c0_i32_0 : i32
    %2 = arith.andi %0, %1 : i1
    %3 = arith.extui %2 : i1 to i32
    %c0_i32_1 = arith.constant 0 : i32
    %4 = arith.cmpi ne, %3, %c0_i32_1 : i32
    scf.if %4 {
      %c0_16 = arith.constant 0 : index
      %c0_17 = arith.constant 0 : index
      %28 = vector.load %arg2[%c0_16, %c0_17] : memref<128x128xf32, #tpu.memory_space<vmem>>, vector<128x128xf32>
      %c0_18 = arith.constant 0 : index
      %c0_19 = arith.constant 0 : index
      %29 = vector.load %arg7[%c0_18, %c0_19] : memref<128x128xf32, #tpu.memory_space<vmem>>, vector<128x128xf32>
      tpu.vector_store %arg7[%c0_18, %c0_19], %28 {strides = array<i32>} : memref<128x128xf32, #tpu.memory_space<vmem>>, vector<128x128xf32>,
    } else {
    }
    %c0_i32_2 = arith.constant 0 : i32
    %5 = arith.cmpi eq, %arg1, %c0_i32_2 : i32
    %6 = arith.extui %5 : i1 to i32
    %c0_i32_3 = arith.constant 0 : i32
    %7 = arith.cmpi ne, %6, %c0_i32_3 : i32
    scf.if %7 {
      %c0_16 = arith.constant 0 : index
      %c0_17 = arith.constant 0 : index
      %28 = vector.load %arg7[%c0_16, %c0_17] : memref<128x128xf32, #tpu.memory_space<vmem>>, vector<128x128xf32>
      %29 = arith.truncf %28 : vector<128x128xf32> to vector<128x128xbf16>
      %c0_18 = arith.constant 0 : index
      %c0_19 = arith.constant 0 : index
      %c0_20 = arith.constant 0 : index
      %30 = vector.load %arg4[%c0_18, %c0_19, %c0_20] : memref<1x128x128xbf16, #tpu.memory_space<vmem>>, vector<1x128x128xbf16>
      %31 = vector.shape_cast %30 : vector<1x128x128xbf16> to vector<128x128xbf16>
      %cst_21 = arith.constant dense<0.000000e+00> : vector<128x128xf32>
      %32 = tpu.matmul %29, %31, %cst_21 {dimension_numbers = #tpu.dot_dimension_numbers<[1], [0], [0], [1], [0, 0, 1, 1], [], []>} : vector<128x128xbf16>, vector<128x128xbf16>, vector<128x128xf32> -> vector<128x128xf32>
      %33 = arith.truncf %32 : vector<128x128xf32> to vector<128x128xbf16>
      %c0_22 = arith.constant 0 : index
      %c0_23 = arith.constant 0 : index
      %34 = vector.load %arg8[%c0_22, %c0_23] : memref<128x128xbf16, #tpu.memory_space<vmem>>, vector<128x128xbf16>
      tpu.vector_store %arg8[%c0_22, %c0_23], %33 {strides = array<i32>} : memref<128x128xbf16, #tpu.memory_space<vmem>>, vector<128x128xbf16>,
    } else {
    }
    %c0 = arith.constant 0 : index
    %c0_4 = arith.constant 0 : index
    %8 = vector.load %arg3[%c0, %c0_4] : memref<128x128xbf16, #tpu.memory_space<vmem>>, vector<128x128xbf16>
    %c0_5 = arith.constant 0 : index
    %c0_6 = arith.constant 0 : index
    %9 = vector.load %arg8[%c0_5, %c0_6] : memref<128x128xbf16, #tpu.memory_space<vmem>>, vector<128x128xbf16>
    %cst = arith.constant dense<0.000000e+00> : vector<128x128xf32>
    %10 = tpu.matmul %8, %9, %cst {dimension_numbers = #tpu.dot_dimension_numbers<[1], [0], [0], [1], [0, 0, 1, 1], [], []>} : vector<128x128xbf16>, vector<128x128xbf16>, vector<128x128xf32> -> vector<128x128xf32>
    %c0_7 = arith.constant 0 : index
    %c0_8 = arith.constant 0 : index
    %c0_9 = arith.constant 0 : index
    %11 = vector.load %arg5[%c0_7, %c0_8, %c0_9] : memref<1x1x128xf32, #tpu.memory_space<vmem>>, vector<1x1x128xf32>
    %12 = vector.shape_cast %11 : vector<1x1x128xf32> to vector<1x128xf32>
    %13 = vector.broadcast %12 : vector<1x128xf32> to vector<128x128xf32>
    %14 = arith.addf %10, %13 : vector<128x128xf32>
    %c128_i32 = arith.constant 128 : i32
    %15 = arith.muli %arg1, %c128_i32 : i32
    %16 = tpu.assume_multiple %15, 128 : i32
    %c0_i32_10 = arith.constant 0 : i32
    %17 = arith.cmpi eq, %arg0, %c0_i32_10 : i32
    %18 = arith.extui %17 : i1 to i32
    %c0_i32_11 = arith.constant 0 : i32
    %19 = arith.cmpi ne, %18, %c0_i32_11 : i32
    scf.if %19 {
      %cst_16 = arith.constant 0.000000e+00 : f32
      %28 = vector.broadcast %cst_16 : f32 to vector<128x128xf32>
      %29 = arith.maximumf %14, %28 : vector<128x128xf32>
      %30 = arith.index_cast %16 : i32 to index
      %c0_17 = arith.constant 0 : index
      %31 = vector.load %arg7[%30, %c0_17] : memref<128x128xf32, #tpu.memory_space<vmem>>, vector<128x128xf32>
      tpu.vector_store %arg7[%30, %c0_17], %29 {strides = array<i32>} : memref<128x128xf32, #tpu.memory_space<vmem>>, vector<128x128xf32>,
    } else {
    }
    %c0_i32_12 = arith.constant 0 : i32
    %20 = arith.cmpi sgt, %arg0, %c0_i32_12 : i32
    %c3_i32 = arith.constant 3 : i32
    %21 = arith.cmpi slt, %arg0, %c3_i32 : i32
    %22 = arith.andi %20, %21 : i1
    %23 = arith.extui %22 : i1 to i32
    %c0_i32_13 = arith.constant 0 : i32
    %24 = arith.cmpi ne, %23, %c0_i32_13 : i32
    scf.if %24 {
      %cst_16 = arith.constant 0.000000e+00 : f32
      %28 = vector.broadcast %cst_16 : f32 to vector<128x128xf32>
      %29 = arith.maximumf %14, %28 : vector<128x128xf32>
      %30 = arith.index_cast %16 : i32 to index
      %c0_17 = arith.constant 0 : index
      %31 = vector.load %arg7[%30, %c0_17] : memref<128x128xf32, #tpu.memory_space<vmem>>, vector<128x128xf32>
      %32 = arith.addf %29, %31 : vector<128x128xf32>
      %33 = arith.index_cast %16 : i32 to index
      %c0_18 = arith.constant 0 : index
      %34 = vector.load %arg7[%33, %c0_18] : memref<128x128xf32, #tpu.memory_space<vmem>>, vector<128x128xf32>
      tpu.vector_store %arg7[%33, %c0_18], %32 {strides = array<i32>} : memref<128x128xf32, #tpu.memory_space<vmem>>, vector<128x128xf32>,
    } else {
    }
    %c3_i32_14 = arith.constant 3 : i32
    %25 = arith.cmpi eq, %arg0, %c3_i32_14 : i32
    %26 = arith.extui %25 : i1 to i32
    %c0_i32_15 = arith.constant 0 : i32
    %27 = arith.cmpi ne, %26, %c0_i32_15 : i32
    scf.if %27 {
      %cst_16 = arith.constant dense<0xFF800000> : vector<128xf32>
      %28 = vector.multi_reduction <maximumf>, %14, %cst_16 [1] : vector<128x128xf32> to vector<128xf32>
      %29 = vector.shape_cast %28 : vector<128xf32> to vector<128x1xf32>
      %30 = vector.broadcast %29 : vector<128x1xf32> to vector<128x128xf32>
      %31 = arith.subf %14, %30 : vector<128x128xf32>
      %32 = math.exp %31 : vector<128x128xf32>
      %cst_17 = arith.constant dense<0.000000e+00> : vector<128xf32>
      %33 = vector.multi_reduction <add>, %32, %cst_17 [1] : vector<128x128xf32> to vector<128xf32>
      %34 = vector.shape_cast %33 : vector<128xf32> to vector<128x1xf32>
      %35 = math.log %34 : vector<128x1xf32>
      %36 = vector.broadcast %35 : vector<128x1xf32> to vector<128x128xf32>
      %37 = arith.subf %31, %36 : vector<128x128xf32>
      %38 = arith.index_cast %16 : i32 to index
      %c0_18 = arith.constant 0 : index
      %39 = vector.load %arg6[%38, %c0_18] : memref<128x128xf32, #tpu.memory_space<vmem>>, vector<128x128xf32>
      tpu.vector_store %arg6[%38, %c0_18], %37 {strides = array<i32>} : memref<128x128xf32, #tpu.memory_space<vmem>>, vector<128x128xf32>,
    } else {
    }
    return
  }
  func.func @transform_0(%arg0: i32, %arg1: i32) -> (i32, i32) {
    %c0_i32 = arith.constant 0 : i32
    %c0_i32_0 = arith.constant 0 : i32
    %c0_i32_1 = arith.constant 0 : i32
    return %c0_i32, %c0_i32_0 : i32, i32
  }
  func.func @transform_1(%arg0: i32, %arg1: i32) -> (i32, i32) {
    %c0_i32 = arith.constant 0 : i32
    %c0_i32_0 = arith.constant 0 : i32
    return %arg1, %c0_i32 : i32, i32
  }
  func.func @transform_2(%arg0: i32, %arg1: i32) -> (i32, i32, i32) {
    %c0_i32 = arith.constant 0 : i32
    %c0_i32_0 = arith.constant 0 : i32
    %c0_i32_1 = arith.constant 0 : i32
    return %arg0, %c0_i32, %c0_i32_0 : i32, i32, i32
  }
  func.func @transform_3(%arg0: i32, %arg1: i32) -> (i32, i32, i32) {
    %c0_i32 = arith.constant 0 : i32
    %c0_i32_0 = arith.constant 0 : i32
    %c0_i32_1 = arith.constant 0 : i32
    return %arg0, %c0_i32, %c0_i32_0 : i32, i32, i32
  }
  func.func @transform_4(%arg0: i32, %arg1: i32) -> (i32, i32) {
    %c0_i32 = arith.constant 0 : i32
    %c0_i32_0 = arith.constant 0 : i32
    %c0_i32_1 = arith.constant 0 : i32
    return %c0_i32, %c0_i32_0 : i32, i32
  }
}

</mosaic_0001>

<bundles_post_ra>
// kernel: tpu_custom_call.1
= control target key start
LH: loop header
LB: loop body
LE: loop exit
PB: predicated region body
PF: predicated region fallthrough
CT: control target
= control target key end

     0   :  { %9 = vsyncpa [#allocation5], 0  ;;  %s2004_s0 = inlined_call_operand.hbm [shape: f32[128,128], index: 0, kind: input, shape index: {}]   ;;  %s2005_s1 = inlined_call_operand.hbm [shape: bf16[128,128], index: 1, kind: input, shape index: {}]   ;;  %s2006_s2 = inlined_call_operand.hbm [shape: bf16[4,128,128], index: 2, kind: input, shape index: {}]   ;;  %s2007_s3 = inlined_call_operand.vmem [shape: f32[4,1,128], index: 3, kind: input, shape index: {}]   ;;  %s2008_s4 = inlined_call_operand.hbm [shape: f32[128,128], index: 4, kind: output, shape index: {}]  }
   0x1   :  { %10 = vsyncpa [#allocation8], 0 }
   0x2   :  { %11 = vsyncpa [#allocation6], 0  ;;  %s1592_s15 = smov 0   ;;  %s1594_s16 = smov 0  }
   0x3   :  { %s1596_s17 = smov 0   ;;  %s1598_s18 = smov 0  }
   0x4   :  { %s1600_s19 = smov 0   ;;  %s1602_s20 = smov 0  }
   0x5 LB: > { %s1621_s21 = sadd.s32 4294967295, %s1555_s20   ;;  %p90_p0 = scmp.ne.s32.totalorder %s1543_s17, %s1539_s16  ;;  %s1555_s20 = sphi %s1602_s20, %s17_s20   ;;  %s1551_s19 = sphi %s1600_s19, %s2029_s19   ;;  %s1547_s18 = sphi %s1598_s18, %s2028_s18   ;;  %s1543_s17 = sphi %s1596_s17, %s2027_s17   ;;  %s1539_s16 = sphi %s1594_s16, %s2026_s16   ;;  %s1535_s15 = sphi %s1592_s15, %s2025_s15  }
   0x6   : > { %p91_p1 = scmp.eq.s32.totalorder %s1555_s20, 0  ;;  %p96_p2 = scmp.ne.s32.totalorder %s1539_s16, %s1535_s15 }
   0x7   : > { %p2009_p3 = scmp.eq.s32.totalorder %s1621_s21, 0  ;;  %p1079_p4 = scmp.ge.s32.totalorder %s1555_s20, 1 }
   0x8   : > { %p92_p5 = por %p91_p1, %p90_p0  ;;  %p154_p6 = scmp.lt.s32.totalorder %s1555_s20, 5 }
   0x9   : > { %p1632_p7 = por %p2009_p3, %p96_p2  ;;  %s1557_s24 = smov [#allocation4]  }
   0xa   : > { %p1636_p8 = pnand %p1079_p4, %p154_p6  ;;  %s166_s25 = sshll.u32 %s1557_s24, 4  ;;  %s167_s25 = int_to_ptr.vmem [resolvable:$true] %s166_s25 }
   0xb   : > { %s2013_s22 = scalar_select %p1632_p7, 1, 0 }
   0xc   : > { %s2014_s23 = scalar_select %p1636_p8, 1, 0 }
   0xd   : > { %p1226_p9 = pneg %p1636_p8  ;;  %p1239_p11 = scmp.lt.s32.totalorder %s1555_s20, 4 }
   0xe   : > { %s1381_s30 = scalar_lea.hbm %s2004_s0, 2048 }
   0xf   : > { %p1644_p10 = pnand %p1226_p9, %p2009_p3  ;;  %p1649_p12 = pnand %p1239_p11, %p92_p5 }
  0x10   : > { %p1382_p13 = scmp.ne.s32.totalorder %s2004_s0, %s1381_s30  ;;  %p1388_p4 = scmp.lt.u32.totalorder %s1381_s30, %s2004_s0 }
  0x11   : > { %s2016_s27 = scalar_select %p1649_p12, 1, 0 }
  0x12   : > { %p1383_p0 = pneg %p1644_p10 }
  0x14   : > { %p1384_p1 = pnand %p1383_p0, %p1382_p13 }
  0x16   : > { %p1385_p2 = pneg %p1384_p1 }
  0x18   : > { %p1390_p5 = pnand %p1388_p4, %p1385_p2 }
  0x1a   : > { %1393 = shalt.err (!%p1390_p5)
}
  0x1b   : > { %s1394_s9 = scalar_lea.vmem %s167_s25, 2048  ;;  %p1402_p3 = scmp.lt.s32.totalorder %s167_s25, %s167_s25 }
  0x1c   : > { %p1395_p6 = scmp.ne.s32.totalorder %s167_s25, %s1394_s9  ;;  %p1403_p7 = scmp.lt.s32.totalorder %s1394_s9, %s1394_s9 }
  0x1e   : > { %p1397_p9 = pnand %p1395_p6, %p1383_p0  ;;  %p1404_p8 = por %p1403_p7, %p1402_p3 }
  0x20   : > { %p1398_p11 = pneg %p1397_p9 }
  0x22   : > { %p1405_p12 = pnand %p1404_p8, %p1398_p11 }
  0x24   : > { %1408 = shalt.err (!%p1405_p12)
}
  0x25   : > { %s1558_s10 = smov 128   ;;  %s1559_s11 = smov 8  }
  0x26   : > { %1229 = dma.hbm_to_vmem [thread:$0]  (!%p1644_p10), %s2004_s0, 2048, %s167_s25, [#allocation5], %s1558_s10, %s1558_s10, %s1559_s11  }
  0x27   : > { %s1560_s14 = smov [#allocation7]   ;;  %s1409_s29 = scalar_lea.hbm %s2005_s1, 1024 }
  0x28   : > { %s182_s15 = sshll.u32 %s1560_s14, 4  ;;  %p1410_p3 = scmp.ne.s32.totalorder %s2005_s1, %s1409_s29  ;;  %s183_s15 = int_to_ptr.vmem [resolvable:$true] %s182_s15 }
  0x29   : > { %p1416_p12 = scmp.lt.u32.totalorder %s1409_s29, %s2005_s1 }
  0x2a   : > { %p1412_p7 = pnand %p1410_p3, %p1383_p0 }
  0x2c   : > { %p1413_p8 = pneg %p1412_p7 }
  0x2e   : > { %p1418_p13 = pnand %p1416_p12, %p1413_p8 }
  0x30   : > { %1421 = shalt.err (!%p1418_p13)
}
  0x31   : > { %s1422_s25 = scalar_lea.vmem %s183_s15, 1024  ;;  %p1430_p5 = scmp.lt.s32.totalorder %s183_s15, %s183_s15 }
  0x32   : > { %p1423_p1 = scmp.ne.s32.totalorder %s183_s15, %s1422_s25  ;;  %p1431_p6 = scmp.lt.s32.totalorder %s1422_s25, %s1422_s25 }
  0x34   : > { %p1425_p2 = pnand %p1423_p1, %p1383_p0  ;;  %p1432_p9 = por %p1431_p6, %p1430_p5 }
  0x36   : > { %p1426_p4 = pneg %p1425_p2 }
  0x38   : > { %p1433_p11 = pnand %p1432_p9, %p1426_p4 }
  0x3a   : > { %1436 = shalt.err (!%p1433_p11)
}
  0x3b   : > { %s1561_s8 = smov 64   ;;  %s1562_s9 = smov 4  }
  0x3c   : > { %1232 = dma.hbm_to_vmem [thread:$0]  (!%p1644_p10), %s2005_s1, 1024, %s183_s15, [#allocation8], %s1561_s8, %s1561_s8, %s1562_s9  }
  0x3d   : > { %s83_s12 = sadd.s32 1, %s1543_s17  ;;  %s196_s13 = sand.u32 1, %s1555_s20  }
  0x3e   : > { %s29_s14 = sadd.s32 1, %s1551_s19  ;;  %s198_s24 = sand.u32 1, %s1543_s17  }
  0x3f   : > { %p31_p0 = scmp.ge.s32.totalorder %s29_s14, 4  ;;  %s1083_s28 = sshll.u32 %s198_s24, 6 }
  0x40   : > { %s1114_s29 = sshll.u32 %s1551_s19, 10  ;;  %s200_s6 = scalar_lea.vmem [#allocation9], %s1083_s28 }
  0x41   : > { %s2031_s14 = smov (%p31_p0, %s29_s14), 0  ;;  %s1708_s5 = scalar_lea.hbm %s2006_s2, %s1114_s29 }
  0x42   : > { %s80_s15 = ssub.s32 %s1551_s19, %s2031_s14  ;;  %s207_s7 = sshll.u32 %s200_s6, 4  ;;  %s1716_s7 = int_to_ptr.vmem [resolvable:$true] %s207_s7 }
  0x43   : > { %p1712_p10 = scmp.eq.s32.totalorder %s80_s15, 0  ;;  %s1718_s10 = scalar_lea.sflag [#allocation5], %s196_s13 }
  0x44   : > { %s1437_s11 = scalar_lea.hbm %s1708_s5, 1024  ;;  %p2018_p7 = scmp.ne.s32.totalorder %s2016_s27, 0 }
  0x45   : > { %p1438_p3 = scmp.ne.s32.totalorder %s1708_s5, %s1437_s11  ;;  %s1442_s28 = scalar_lea.hbm %s2006_s2, 4096 }
  0x46   : > { %p1439_p8 = pneg %p2018_p7  ;;  %p1443_p1 = scmp.lt.u32.totalorder %s1708_s5, %s2006_s2 }
  0x47   : > { %p1444_p2 = scmp.lt.u32.totalorder %s1442_s28, %s1437_s11  ;;  %p1446_p5 = scmp.lt.u32.totalorder %s1437_s11, %s1708_s5 }
  0x48   : > { %p1440_p12 = pnand %p1439_p8, %p1438_p3 }
  0x49   : > { %p1445_p4 = por %p1444_p2, %p1443_p1 }
  0x4a   : > { %p1441_p13 = pneg %p1440_p12 }
  0x4b   : > { %p1447_p6 = por %p1446_p5, %p1445_p4 }
  0x4d   : > { %p1448_p9 = pnand %p1447_p6, %p1441_p13 }
  0x4f   : > { %1451 = shalt.err (!%p1448_p9)
}
  0x50   : > { %s1452_s13 = scalar_lea.vmem %s1716_s7, 1024  ;;  %s1563_s15 = smov [#allocation9]  }
  0x51   : > { %p1453_p11 = scmp.ne.s32.totalorder %s1716_s7, %s1452_s13  ;;  %s1457_s6 = sshll.u32 %s1563_s15, 4  ;;  %s1458_s6 = int_to_ptr.vmem [resolvable:$false] %s1457_s6 }
  0x52   : > { %s1459_s24 = scalar_lea.vmem %s1458_s6, 2048  ;;  %p1460_p12 = scmp.lt.s32.totalorder %s1716_s7, %s1458_s6 }
  0x53   : > { %p1455_p0 = pnand %p1453_p11, %p1439_p8  ;;  %p1461_p1 = scmp.lt.s32.totalorder %s1459_s24, %s1452_s13 }
  0x55   : > { %p1456_p3 = pneg %p1455_p0  ;;  %p1462_p2 = por %p1461_p1, %p1460_p12 }
  0x57   : > { %p1463_p4 = pnand %p1462_p2, %p1456_p3 }
  0x59   : > { %1466 = shalt.err (!%p1463_p4)
}
  0x5a   : > { %1236 = dma.hbm_to_vmem [thread:$0]  (!%p2018_p7), %s1708_s5, 1024, %s1716_s7, %s1718_s10, %s1561_s8, %s1561_s8, %s1562_s9  }
  0x5b   : > { %s1754_s11 = scalar_select %p1712_p10, %s1543_s17, %s83_s12  }
  0x5c   : > { %p2019_p8 = scmp.ne.s32.totalorder %s2014_s23, 0 }
  0x5d   : > { %p2020_p13 = scmp.eq.s32.totalorder (!%p2019_p8), %s1621_s21, 0 }
  0x5e   : > { %225 = sbr.rel (%p2019_p8) target bundleno = 1037 (0x40d), region = 36 }
  0x65   : > { %1518 = dma.done.wait (%p2020_p13), [#allocation5], 2048   ;;  %p2021_p5 = pmov %p2020_p13 }
  0x67   : > { %1520 = vsyncadd (%p2021_p5), [#allocation5], 4294965248  ;;  %p2022_p6 = pmov %p2021_p5 }
  0x68   : > { %p2023_p9 = pmov %p2021_p5 }
  0x69   : > { %1522 = dma.done.wait (%p2022_p6), [#allocation8], 1024  }
  0x6a   : > { %1524 = vsyncadd (%p2023_p9), [#allocation8], 4294966272  ;;  %s235_s27 = sand.u32 1, %s1621_s21   ;;  %s237_s8 = sand.u32 1, %s1539_s16  }
  0x6b   : > { %s1089_s9 = sshll.u32 %s237_s8, 6  ;;  %s236_s23 = scalar_lea.sflag [#allocation5], %s235_s27 }
  0x6c   : > { %s1768_s12 = scalar_lea.vmem [#allocation9], %s1089_s9  ;;  %p2024_p10 = scmp.ne.s32.totalorder %s2013_s22, 0 }
  0x6e   : > { %1526 = dma.done.wait (%p2024_p10), %s236_s23, 1024  }
  0x6f   : > { %1528 = vsyncadd (%p2024_p10), %s236_s23, 4294966272  ;;  %p263_p7 = scmp.lt.s32.totalorder %s1547_s18, 3  ;;  %p267_p11 = scmp.eq.s32.totalorder %s1547_s18, 0 }
  0x70   : > { %v273_v0 = vld [vmem:[#allocation4] sm:$0xff] (%p267_p11)  ;;  %v274_v1 = vld [vmem:[#allocation4 + $0x8] sm:$0xff] (%p267_p11)  ;;  %v275_v2 = vld [vmem:[#allocation4 + $0x10] sm:$0xff] (%p267_p11) }
  0x71   : > { %s1779_s5 = scalar_select %p263_p7, %s1547_s18, 3 }
  0x72   : > { %272 = sbr.rel (!%p267_p11) target bundleno = 122 (0x7a), region = 52  ;;  %289 = vst [vmem:[#allocation2] sm:$0xff] (%p267_p11), %v273_v0  ;;  %290 = vst [vmem:[#allocation2 + $0x8] sm:$0xff] (%p267_p11), %v274_v1  ;;  %v276_v3 = vld [vmem:[#allocation4 + $0x18] sm:$0xff] (%p267_p11)  ;;  %v277_v4 = vld [vmem:[#allocation4 + $0x20] sm:$0xff] (%p267_p11) }
  0x73   : > { %s265_s10 = scalar_lea.vmem %s2007_s3, %s1779_s5  ;;  %291 = vst [vmem:[#allocation2 + $0x10] sm:$0xff] (%p267_p11), %v275_v2  ;;  %v278_v5 = vld [vmem:[#allocation4 + $0x28] sm:$0xff] (%p267_p11)  ;;  %292 = vst [vmem:[#allocation2 + $0x18] sm:$0xff] (%p267_p11), %v276_v3  ;;  %v279_v6 = vld [vmem:[#allocation4 + $0x30] sm:$0xff] (%p267_p11) }
  0x74   : > { %293 = vst [vmem:[#allocation2 + $0x20] sm:$0xff] (%p267_p11), %v277_v4  ;;  %294 = vst [vmem:[#allocation2 + $0x28] sm:$0xff] (%p267_p11), %v278_v5  ;;  %v280_v7 = vld [vmem:[#allocation4 + $0x38] sm:$0xff] (%p267_p11)  ;;  %v281_v8 = vld [vmem:[#allocation4 + $0x40] sm:$0xff] (%p267_p11) }
  0x75   : > { %295 = vst [vmem:[#allocation2 + $0x30] sm:$0xff] (%p267_p11), %v279_v6  ;;  %296 = vst [vmem:[#allocation2 + $0x38] sm:$0xff] (%p267_p11), %v280_v7  ;;  %v282_v9 = vld [vmem:[#allocation4 + $0x48] sm:$0xff] (%p267_p11)  ;;  %v283_v10 = vld [vmem:[#allocation4 + $0x50] sm:$0xff] (%p267_p11) }
  0x76   : > { %297 = vst [vmem:[#allocation2 + $0x40] sm:$0xff] (%p267_p11), %v281_v8  ;;  %v284_v11 = vld [vmem:[#allocation4 + $0x58] sm:$0xff] (%p267_p11)  ;;  %298 = vst [vmem:[#allocation2 + $0x48] sm:$0xff] (%p267_p11), %v282_v9  ;;  %v285_v12 = vld [vmem:[#allocation4 + $0x60] sm:$0xff] (%p267_p11) }
  0x77   : > { %299 = vst [vmem:[#allocation2 + $0x50] sm:$0xff] (%p267_p11), %v283_v10  ;;  %300 = vst [vmem:[#allocation2 + $0x58] sm:$0xff] (%p267_p11), %v284_v11  ;;  %v286_v13 = vld [vmem:[#allocation4 + $0x68] sm:$0xff] (%p267_p11)  ;;  %v287_v14 = vld [vmem:[#allocation4 + $0x70] sm:$0xff] (%p267_p11) }
  0x78   : > { %301 = vst [vmem:[#allocation2 + $0x60] sm:$0xff] (%p267_p11), %v285_v12  ;;  %302 = vst [vmem:[#allocation2 + $0x68] sm:$0xff] (%p267_p11), %v286_v13  ;;  %v288_v15 = vld [vmem:[#allocation4 + $0x78] sm:$0xff] (%p267_p11) }
  0x79   : > { %303 = vst [vmem:[#allocation2 + $0x70] sm:$0xff] %v287_v14  ;;  %304 = vst [vmem:[#allocation2 + $0x78] sm:$0xff] %v288_v15 }
  0x7a PF: > { %v1301_v16 = vld [vmem:[%s1768_s12] sm:$0xff]   ;;  %v1302_v17 = vld [vmem:[%s1768_s12 + $0x8] sm:$0xff]   ;;  %v1303_v18 = vld [vmem:[%s1768_s12 + $0x10] sm:$0xff]   ;;  %p1108_p0 = scmp.ne.s32.totalorder %s1547_s18, 0 }
  0x7b   : > { %1148 = vmatprep.subr.bf16.mxu0 %v1301_v16  ;;  %v1304_v19 = vld [vmem:[%s1768_s12 + $0x18] sm:$0xff]   ;;  %v308_v20 = vld [vmem:[#allocation2] sm:$0xff]  ;;  %v309_v21 = vld [vmem:[#allocation2 + $0x8] sm:$0xff] }
  0x7c   : > { %1149 = vmatpush3.bf16.msra.mxu0 %v1301_v16  ;;  %v324_v22 = vpack.c.bf16 %v309_v21, %v308_v20  ;;  %v1305_v23 = vld [vmem:[%s1768_s12 + $0x20] sm:$0xff]   ;;  %v1306_v24 = vld [vmem:[%s1768_s12 + $0x28] sm:$0xff]   ;;  %v1307_v25 = vld [vmem:[%s1768_s12 + $0x30] sm:$0xff]  }
  0x7d   : > { %1150 = vmatprep.subr.bf16.mxu0 %v1302_v17  ;;  %v1308_v26 = vld [vmem:[%s1768_s12 + $0x38] sm:$0xff]   ;;  %v310_v27 = vld [vmem:[#allocation2 + $0x10] sm:$0xff]  ;;  %v312_v29 = vld [vmem:[#allocation2 + $0x20] sm:$0xff] }
  0x7e   : > { %1164 = vmatprep.mubr.bf16.mxu0 %v324_v22  ;;  %v311_v28 = vld [vmem:[#allocation2 + $0x18] sm:$0xff]  ;;  %v313_v30 = vld [vmem:[#allocation2 + $0x28] sm:$0xff]  ;;  %v314_v33 = vld [vmem:[#allocation2 + $0x30] sm:$0xff] }
  0x7f   : > { %v325_v31 = vpack.c.bf16 %v311_v28, %v310_v27  ;;  %v326_v32 = vpack.c.bf16 %v313_v30, %v312_v29  ;;  %v315_v34 = vld [vmem:[#allocation2 + $0x38] sm:$0xff]  ;;  %v316_v35 = vld [vmem:[#allocation2 + $0x40] sm:$0xff]  ;;  %v317_v36 = vld [vmem:[#allocation2 + $0x48] sm:$0xff] }
  0x80   : > { %1151 = vmatpush3.bf16.msra.mxu0 %v1302_v17  ;;  %v327_v37 = vpack.c.bf16 %v315_v34, %v314_v33  ;;  %v328_v38 = vpack.c.bf16 %v317_v36, %v316_v35  ;;  %v318_v39 = vld [vmem:[#allocation2 + $0x50] sm:$0xff]  ;;  %v319_v40 = vld [vmem:[#allocation2 + $0x58] sm:$0xff]  ;;  %v320_v41 = vld [vmem:[#allocation2 + $0x60] sm:$0xff] }
  0x81   : > { %1152 = vmatprep.subr.bf16.mxu0 %v1303_v18  ;;  %v321_v42 = vld [vmem:[#allocation2 + $0x68] sm:$0xff]  ;;  %v329_v43 = vpack.c.bf16 %v319_v40, %v318_v39  ;;  %v322_v45 = vld [vmem:[#allocation2 + $0x70] sm:$0xff]  ;;  %v323_v46 = vld [vmem:[#allocation2 + $0x78] sm:$0xff] }
  0x82   : > { %v330_v44 = vpack.c.bf16 %v321_v42, %v320_v41  ;;  %v331_v47 = vpack.c.bf16 %v323_v46, %v322_v45  ;;  %v1309_v48 = vld [vmem:[#allocation7] sm:$0xff]   ;;  %v1310_v9 = vld [vmem:[#allocation7 + $0x8] sm:$0xff]   ;;  %v1311_v10 = vld [vmem:[#allocation7 + $0x10] sm:$0xff]  }
  0x83   : > { %1196 = vmatprep.mubr.bf16.mxu1 %v1309_v48  ;;  %v1312_v11 = vld [vmem:[#allocation7 + $0x18] sm:$0xff]   ;;  %v1313_v12 = vld [vmem:[#allocation7 + $0x20] sm:$0xff]   ;;  %v1314_v13 = vld [vmem:[#allocation7 + $0x28] sm:$0xff]  }
  0x84   : > { %1153 = vmatpush3.bf16.msra.mxu0 %v1303_v18  ;;  %v1315_v14 = vld [vmem:[#allocation7 + $0x30] sm:$0xff]   ;;  %v1316_v15 = vld [vmem:[#allocation7 + $0x38] sm:$0xff]   ;;  %v1099_v16 = vld [vmem:[%s265_s10] ss:$0 sm:$0xff] }
  0x85   : > { %1154 = vmatprep.subr.bf16.mxu0 %v1304_v19 }
  0x88   : > { %1155 = vmatpush3.bf16.msra.mxu0 %v1304_v19 }
  0x89   : > { %1156 = vmatprep.subr.bf16.mxu0 %v1305_v23 }
  0x8c   : > { %1157 = vmatpush3.bf16.msra.mxu0 %v1305_v23 }
  0x8d   : > { %1158 = vmatprep.subr.bf16.mxu0 %v1306_v24 }
  0x90   : > { %1159 = vmatpush3.bf16.msra.mxu0 %v1306_v24 }
  0x91   : > { %1160 = vmatprep.subr.bf16.mxu0 %v1307_v25 }
  0x94   : > { %1161 = vmatpush3.bf16.msra.mxu0 %v1307_v25 }
  0x95   : > { %1162 = vmatprep.subr.bf16.mxu0 %v1308_v26 }
  0x98   : > { %1163 = vmatpush3.bf16.msra.mxu0 %v1308_v26 }
  0x9b   : > { %1165 = vmatmul.mubr.bf16.vlgmr.msra.gmra.mrb[0].mxu0 %v325_v31 }
  0x9c   : > { %1168 = vmatprep.mubr.bf16.mxu0 %v326_v32 }
  0xa3   : > { %1169 = vmatmul.mubr.bf16.gmra.mrb[4].mxu0 %v327_v37 }
  0xa4   : > { %1172 = vmatprep.mubr.bf16.mxu0 %v328_v38 }
  0xab   : > { %1173 = vmatmul.mubr.bf16.gmra.mrb[8].mxu0 %v329_v43 }
  0xac   : > { %1176 = vmatprep.mubr.bf16.mxu0 %v330_v44 }
  0xb3   : > { %1177 = vmatmul.mubr.bf16.gmra.mrb[12].mxu0 %v331_v47 }
 0x16e   : > { %v1166_v49 = vpop.f32.mrb[0].mxu0 }
 0x16f   : > { %v430_v50 = vpop.f32.mrb[1].mxu0 }
 0x170   : > { %v1167_v51 = vpop.f32.mrb[2].mxu0 }
 0x171   : > { %v494_v52 = vpack.c.bf16 %v1167_v51, %v1166_v49  ;;  %v433_v53 = vpop.f32.mrb[3].mxu0 }
 0x172   : > { %v493_v54 = vpack.c.bf16 %v433_v53, %v430_v50 }
 0x174   : > { %1180 = vmatprep.subr.bf16.mxu1 %v493_v54 }
 0x175   : > { %1181 = vmatpush3.bf16.msra.mxu1 %v493_v54 }
 0x176   : > { %v1170_v55 = vpop.f32.mrb[4].mxu0  ;;  %1182 = vmatprep.subr.bf16.mxu1 %v494_v52 }
 0x177   : > { %v446_v56 = vpop.f32.mrb[5].mxu0 }
 0x178   : > { %v1171_v57 = vpop.f32.mrb[6].mxu0 }
 0x179   : > { %v496_v58 = vpack.c.bf16 %v1171_v57, %v1170_v55  ;;  %v449_v59 = vpop.f32.mrb[7].mxu0  ;;  %1183 = vmatpush3.bf16.msra.mxu1 %v494_v52 }
 0x17a   : > { %v495_v60 = vpack.c.bf16 %v449_v59, %v446_v56 }
 0x17c   : > { %1184 = vmatprep.subr.bf16.mxu1 %v495_v60 }
 0x17d   : > { %1185 = vmatpush3.bf16.msra.mxu1 %v495_v60 }
 0x17e   : > { %v1174_v61 = vpop.f32.mrb[8].mxu0  ;;  %1186 = vmatprep.subr.bf16.mxu1 %v496_v58 }
 0x17f   : > { %v462_v62 = vpop.f32.mrb[9].mxu0 }
 0x180   : > { %v1175_v63 = vpop.f32.mrb[10].mxu0 }
 0x181   : > { %v498_v0 = vpack.c.bf16 %v1175_v63, %v1174_v61  ;;  %v465_v1 = vpop.f32.mrb[11].mxu0  ;;  %1187 = vmatpush3.bf16.msra.mxu1 %v496_v58 }
 0x182   : > { %v497_v2 = vpack.c.bf16 %v465_v1, %v462_v62 }
 0x184   : > { %1188 = vmatprep.subr.bf16.mxu1 %v497_v2 }
 0x185   : > { %1189 = vmatpush3.bf16.msra.mxu1 %v497_v2 }
 0x186   : > { %v1178_v3 = vpop.f32.mrb[12].mxu0  ;;  %1190 = vmatprep.subr.bf16.mxu1 %v498_v0 }
 0x187   : > { %v478_v4 = vpop.f32.mrb[13].mxu0 }
 0x188   : > { %v1179_v5 = vpop.f32.mrb[14].mxu0 }
 0x189   : > { %v500_v6 = vpack.c.bf16 %v1179_v5, %v1178_v3  ;;  %v481_v7 = vpop.f32.mrb[15].mxu0  ;;  %1191 = vmatpush3.bf16.msra.mxu1 %v498_v0 }
 0x18a   : > { %v499_v8 = vpack.c.bf16 %v481_v7, %v478_v4 }
 0x18c   : > { %1192 = vmatprep.subr.bf16.mxu1 %v499_v8 }
 0x18d   : > { %1193 = vmatpush3.bf16.msra.mxu1 %v499_v8 }
 0x18e   : > { %1194 = vmatprep.subr.bf16.mxu1 %v500_v6 }
 0x191   : > { %1195 = vmatpush3.bf16.msra.mxu1 %v500_v6 }
 0x194   : > { %1197 = vmatmul.mubr.bf16.vlgmr.msra.gmra.mrb[0].mxu1 %v1310_v9 }
 0x195   : > { %1200 = vmatprep.mubr.bf16.mxu1 %v1311_v10 }
 0x19c   : > { %1201 = vmatmul.mubr.bf16.gmra.mrb[4].mxu1 %v1312_v11 }
 0x19d   : > { %1204 = vmatprep.mubr.bf16.mxu1 %v1313_v12 }
 0x1a4   : > { %1205 = vmatmul.mubr.bf16.gmra.mrb[8].mxu1 %v1314_v13 }
 0x1a5   : > { %1208 = vmatprep.mubr.bf16.mxu1 %v1315_v14 }
 0x1ac   : > { %1209 = vmatmul.mubr.bf16.gmra.mrb[12].mxu1 %v1316_v15 }
 0x267   : > { %v1198_v17 = vpop.f32.mrb[0].mxu1 }
 0x268   : > { %v1798_v18 = vadd.f32 %v1198_v17, %v1099_v16  ;;  %v622_v19 = vpop.f32.mrb[1].mxu1 }
 0x269   : > { %v1800_v20 = vadd.f32 %v1099_v16, %v622_v19  ;;  %v1199_v21 = vpop.f32.mrb[2].mxu1 }
 0x26a   : > { %v1802_v22 = vadd.f32 %v1199_v21, %v1099_v16  ;;  %v625_v23 = vpop.f32.mrb[3].mxu1  ;;  %v691_v51 = vmax.f32 (!%p1108_p0), %v1798_v18, 0.0 }
 0x26b   : > { %v1804_v24 = vadd.f32 %v1099_v16, %v625_v23  ;;  %v689_v49 = vmax.f32 (!%p1108_p0), %v1800_v20, 0.0 }
 0x26c   : > { %v692_v52 = vmax.f32 (!%p1108_p0), %v1802_v22, 0.0  ;;  %708 = vst [vmem:[#allocation2 + $0x10] sm:$0xff] (!%p1108_p0), %v691_v51 }
 0x26d   : > { %v690_v50 = vmax.f32 (!%p1108_p0), %v1804_v24, 0.0  ;;  %706 = vst [vmem:[#allocation2] sm:$0xff] (!%p1108_p0), %v689_v49 }
 0x26e   : > { %709 = vst [vmem:[#allocation2 + $0x18] sm:$0xff] (!%p1108_p0), %v692_v52 }
 0x26f   : > { %v1202_v25 = vpop.f32.mrb[4].mxu1  ;;  %707 = vst [vmem:[#allocation2 + $0x8] sm:$0xff] (!%p1108_p0), %v690_v50 }
 0x270   : > { %v1806_v26 = vadd.f32 %v1202_v25, %v1099_v16  ;;  %v638_v27 = vpop.f32.mrb[5].mxu1 }
 0x271   : > { %v1808_v28 = vadd.f32 %v1099_v16, %v638_v27  ;;  %v1203_v29 = vpop.f32.mrb[6].mxu1 }
 0x272   : > { %v1810_v30 = vadd.f32 %v1203_v29, %v1099_v16  ;;  %v641_v31 = vpop.f32.mrb[7].mxu1  ;;  %v695_v55 = vmax.f32 (!%p1108_p0), %v1806_v26, 0.0 }
 0x273   : > { %v1812_v32 = vadd.f32 %v1099_v16, %v641_v31  ;;  %v693_v53 = vmax.f32 (!%p1108_p0), %v1808_v28, 0.0 }
 0x274   : > { %v696_v56 = vmax.f32 (!%p1108_p0), %v1810_v30, 0.0  ;;  %712 = vst [vmem:[#allocation2 + $0x30] sm:$0xff] (!%p1108_p0), %v695_v55 }
 0x275   : > { %v694_v54 = vmax.f32 (!%p1108_p0), %v1812_v32, 0.0  ;;  %710 = vst [vmem:[#allocation2 + $0x20] sm:$0xff] (!%p1108_p0), %v693_v53 }
 0x276   : > { %713 = vst [vmem:[#allocation2 + $0x38] sm:$0xff] (!%p1108_p0), %v696_v56 }
 0x277   : > { %v1206_v33 = vpop.f32.mrb[8].mxu1  ;;  %711 = vst [vmem:[#allocation2 + $0x28] sm:$0xff] (!%p1108_p0), %v694_v54 }
 0x278   : > { %v1814_v34 = vadd.f32 %v1206_v33, %v1099_v16  ;;  %v654_v35 = vpop.f32.mrb[9].mxu1 }
 0x279   : > { %v1816_v36 = vadd.f32 %v1099_v16, %v654_v35  ;;  %v1207_v37 = vpop.f32.mrb[10].mxu1 }
 0x27a   : > { %v1818_v38 = vadd.f32 %v1207_v37, %v1099_v16  ;;  %v657_v39 = vpop.f32.mrb[11].mxu1  ;;  %v699_v59 = vmax.f32 (!%p1108_p0), %v1814_v34, 0.0 }
 0x27b   : > { %v1820_v40 = vadd.f32 %v1099_v16, %v657_v39  ;;  %v697_v57 = vmax.f32 (!%p1108_p0), %v1816_v36, 0.0 }
 0x27c   : > { %v700_v60 = vmax.f32 (!%p1108_p0), %v1818_v38, 0.0  ;;  %716 = vst [vmem:[#allocation2 + $0x50] sm:$0xff] (!%p1108_p0), %v699_v59 }
 0x27d   : > { %688 = sbr.rel (%p1108_p0) target bundleno = 648 (0x288), region = 60  ;;  %v698_v58 = vmax.f32 (!%p1108_p0), %v1820_v40, 0.0  ;;  %714 = vst [vmem:[#allocation2 + $0x40] sm:$0xff] (!%p1108_p0), %v697_v57 }
 0x27e   : > { %717 = vst [vmem:[#allocation2 + $0x58] sm:$0xff] (!%p1108_p0), %v700_v60 }
 0x27f   : > { %v1210_v41 = vpop.f32.mrb[12].mxu1  ;;  %715 = vst [vmem:[#allocation2 + $0x48] sm:$0xff] (!%p1108_p0), %v698_v58 }
 0x280   : > { %v1822_v42 = vadd.f32 %v1210_v41, %v1099_v16  ;;  %v670_v43 = vpop.f32.mrb[13].mxu1 }
 0x281   : > { %v1824_v44 = vadd.f32 %v1099_v16, %v670_v43  ;;  %v1211_v45 = vpop.f32.mrb[14].mxu1 }
 0x282   : > { %v1826_v46 = vadd.f32 %v1211_v45, %v1099_v16  ;;  %v673_v47 = vpop.f32.mrb[15].mxu1  ;;  %v703_v63 = vmax.f32 (!%p1108_p0), %v1822_v42, 0.0 }
 0x283   : > { %v1828_v48 = vadd.f32 %v1099_v16, %v673_v47  ;;  %v701_v61 = vmax.f32 (!%p1108_p0), %v1824_v44, 0.0 }
 0x284   : > { %v704_v0 = vmax.f32 %v1826_v46, 0.0  ;;  %720 = vst [vmem:[#allocation2 + $0x70] sm:$0xff] %v703_v63 }
 0x285   : > { %v702_v62 = vmax.f32 %v1828_v48, 0.0  ;;  %718 = vst [vmem:[#allocation2 + $0x60] sm:$0xff] %v701_v61 }
 0x286   : > { %721 = vst [vmem:[#allocation2 + $0x78] sm:$0xff] %v704_v0 }
 0x287   : > { %719 = vst [vmem:[#allocation2 + $0x68] sm:$0xff] %v702_v62 }
 0x288 PF: > { %p722_p3 = scmp.gt.s32.totalorder %s1547_s18, 0 }
 0x28a   : > { %p724_p12 = pnand %p722_p3, %p263_p7 }
 0x28b   : > { %v728_v1 = vmax.f32 (!%p724_p12), %v1800_v20, 0.0  ;;  %v745_v2 = vld [vmem:[#allocation2] sm:$0xff] (!%p724_p12)  ;;  %v729_v3 = vmax.f32 (!%p724_p12), %v1804_v24, 0.0  ;;  %v746_v4 = vld [vmem:[#allocation2 + $0x8] sm:$0xff] (!%p724_p12)  ;;  %v730_v5 = vmax.f32 (!%p724_p12), %v1798_v18, 0.0  ;;  %v747_v6 = vld [vmem:[#allocation2 + $0x10] sm:$0xff] (!%p724_p12) }
 0x28c   : > { %727 = sbr.rel (%p724_p12) target bundleno = 663 (0x297), region = 64  ;;  %v731_v7 = vmax.f32 (!%p724_p12), %v1802_v22, 0.0  ;;  %v748_v8 = vld [vmem:[#allocation2 + $0x18] sm:$0xff] (!%p724_p12)  ;;  %v732_v9 = vmax.f32 (!%p724_p12), %v1808_v28, 0.0  ;;  %v749_v10 = vld [vmem:[#allocation2 + $0x20] sm:$0xff] (!%p724_p12)  ;;  %v733_v11 = vmax.f32 (!%p724_p12), %v1812_v32, 0.0 }
 0x28d   : > { %v750_v12 = vld [vmem:[#allocation2 + $0x28] sm:$0xff] (!%p724_p12)  ;;  %v761_v13 = vadd.f32 (!%p724_p12), %v745_v2, %v728_v1  ;;  %v762_v14 = vadd.f32 (!%p724_p12), %v746_v4, %v729_v3  ;;  %v763_v15 = vadd.f32 (!%p724_p12), %v747_v6, %v730_v5  ;;  %v734_v16 = vmax.f32 (!%p724_p12), %v1806_v26, 0.0  ;;  %v751_v17 = vld [vmem:[#allocation2 + $0x30] sm:$0xff] (!%p724_p12)  ;;  %v752_v19 = vld [vmem:[#allocation2 + $0x38] sm:$0xff] (!%p724_p12) }
 0x28e   : > { %v764_v21 = vadd.f32 (!%p724_p12), %v748_v8, %v731_v7  ;;  %v765_v23 = vadd.f32 (!%p724_p12), %v749_v10, %v732_v9  ;;  %v766_v25 = vadd.f32 (!%p724_p12), %v750_v12, %v733_v11  ;;  %v735_v27 = vmax.f32 (!%p724_p12), %v1810_v30, 0.0  ;;  %v753_v29 = vld [vmem:[#allocation2 + $0x40] sm:$0xff] (!%p724_p12)  ;;  %v754_v31 = vld [vmem:[#allocation2 + $0x48] sm:$0xff] (!%p724_p12)  ;;  %v755_v33 = vld [vmem:[#allocation2 + $0x50] sm:$0xff] (!%p724_p12) }
 0x28f   : > { %777 = vst [vmem:[#allocation2] sm:$0xff] (!%p724_p12), %v761_v13  ;;  %778 = vst [vmem:[#allocation2 + $0x8] sm:$0xff] (!%p724_p12), %v762_v14  ;;  %v767_v35 = vadd.f32 (!%p724_p12), %v751_v17, %v734_v16  ;;  %v736_v37 = vmax.f32 (!%p724_p12), %v1816_v36, 0.0  ;;  %v737_v39 = vmax.f32 (!%p724_p12), %v1820_v40, 0.0  ;;  %v738_v41 = vmax.f32 (!%p724_p12), %v1814_v34, 0.0  ;;  %v756_v43 = vld [vmem:[#allocation2 + $0x58] sm:$0xff] (!%p724_p12) }
 0x290   : > { %779 = vst [vmem:[#allocation2 + $0x10] sm:$0xff] (!%p724_p12), %v763_v15  ;;  %v757_v45 = vld [vmem:[#allocation2 + $0x60] sm:$0xff] (!%p724_p12)  ;;  %v758_v47 = vld [vmem:[#allocation2 + $0x68] sm:$0xff] (!%p724_p12)  ;;  %780 = vst [vmem:[#allocation2 + $0x18] sm:$0xff] (!%p724_p12), %v764_v21  ;;  %v768_v49 = vadd.f32 (!%p724_p12), %v752_v19, %v735_v27  ;;  %v739_v50 = vmax.f32 (!%p724_p12), %v1818_v38, 0.0  ;;  %v740_v51 = vmax.f32 (!%p724_p12), %v1824_v44, 0.0 }
 0x291   : > { %781 = vst [vmem:[#allocation2 + $0x20] sm:$0xff] (!%p724_p12), %v765_v23  ;;  %782 = vst [vmem:[#allocation2 + $0x28] sm:$0xff] (!%p724_p12), %v766_v25  ;;  %v741_v52 = vmax.f32 (!%p724_p12), %v1828_v48, 0.0  ;;  %v759_v53 = vld [vmem:[#allocation2 + $0x70] sm:$0xff] (!%p724_p12)  ;;  %v769_v54 = vadd.f32 (!%p724_p12), %v753_v29, %v736_v37  ;;  %v770_v55 = vadd.f32 (!%p724_p12), %v754_v31, %v737_v39  ;;  %v771_v56 = vadd.f32 (!%p724_p12), %v755_v33, %v738_v41  ;;  %v760_v58 = vld [vmem:[#allocation2 + $0x78] sm:$0xff] (!%p724_p12) }
 0x292   : > { %783 = vst [vmem:[#allocation2 + $0x30] sm:$0xff] (!%p724_p12), %v767_v35  ;;  %v742_v57 = vmax.f32 (!%p724_p12), %v1822_v42, 0.0  ;;  %784 = vst [vmem:[#allocation2 + $0x38] sm:$0xff] (!%p724_p12), %v768_v49  ;;  %v772_v59 = vadd.f32 (!%p724_p12), %v756_v43, %v739_v50  ;;  %v773_v60 = vadd.f32 (!%p724_p12), %v757_v45, %v740_v51  ;;  %v743_v62 = vmax.f32 (!%p724_p12), %v1826_v46, 0.0 }
 0x293   : > { %v774_v61 = vadd.f32 %v758_v47, %v741_v52  ;;  %785 = vst [vmem:[#allocation2 + $0x40] sm:$0xff] %v769_v54  ;;  %786 = vst [vmem:[#allocation2 + $0x48] sm:$0xff] %v770_v55 }
 0x294   : > { %787 = vst [vmem:[#allocation2 + $0x50] sm:$0xff] %v771_v56  ;;  %v775_v63 = vadd.f32 %v759_v53, %v742_v57  ;;  %788 = vst [vmem:[#allocation2 + $0x58] sm:$0xff] %v772_v59  ;;  %v776_v0 = vadd.f32 %v760_v58, %v743_v62 }
 0x295   : > { %789 = vst [vmem:[#allocation2 + $0x60] sm:$0xff] %v773_v60  ;;  %790 = vst [vmem:[#allocation2 + $0x68] sm:$0xff] %v774_v61 }
 0x296   : > { %791 = vst [vmem:[#allocation2 + $0x70] sm:$0xff] %v775_v63  ;;  %792 = vst [vmem:[#allocation2 + $0x78] sm:$0xff] %v776_v0 }
 0x297 PF: > { %p1109_p1 = scmp.ne.s32.totalorder %s1547_s18, 3 }
 0x298   : > { %797 = vmax.xlane.f32.xlu0 (!%p1109_p1), %v1800_v20  ;;  %801 = vmax.xlane.f32.xlu1 (!%p1109_p1), %v1798_v18 }
 0x299   : > { %796 = sbr.rel (%p1109_p1) target bundleno = 1011 (0x3f3), region = 68 }
 0x29c   : > { %799 = vmax.xlane.f32.xlu0 (!%p1109_p1), %v1804_v24  ;;  %803 = vmax.xlane.f32.xlu1 (!%p1109_p1), %v1802_v22 }
 0x2a0   : > { %805 = vmax.xlane.f32.xlu0 %v1808_v28  ;;  %807 = vmax.xlane.f32.xlu1 %v1812_v32 }
 0x2a4   : > { %809 = vmax.xlane.f32.xlu0 %v1806_v26  ;;  %811 = vmax.xlane.f32.xlu1 %v1810_v30 }
 0x2a8   : > { %813 = vmax.xlane.f32.xlu0 %v1816_v36  ;;  %815 = vmax.xlane.f32.xlu1 %v1820_v40 }
 0x2ac   : > { %817 = vmax.xlane.f32.xlu0 %v1814_v34  ;;  %819 = vmax.xlane.f32.xlu1 %v1818_v38 }
 0x2b0   : > { %821 = vmax.xlane.f32.xlu0 %v1824_v44  ;;  %823 = vmax.xlane.f32.xlu1 %v1828_v48 }
 0x2b4   : > { %825 = vmax.xlane.f32.xlu0 %v1822_v42  ;;  %827 = vmax.xlane.f32.xlu1 %v1826_v46 }
 0x325   : > { %v798_v1 = vpop.xlane.xlu0 %797  ;;  %v802_v2 = vpop.xlane.xlu1 %801 }
 0x326   : > { %v1884_v3 = vsub.f32 %v1800_v20, %v798_v1  ;;  %v1887_v4 = vsub.f32 %v1798_v18, %v802_v2 }
 0x328   : > { %v845_v5 = vmul.f32 1.442695, %v1884_v3  ;;  %v849_v6 = vmul.f32 1.442695, %v1887_v4 }
 0x329   : > { %v800_v7 = vpop.xlane.xlu0 %799  ;;  %v804_v8 = vpop.xlane.xlu1 %803 }
 0x32a   : > { %1317 = vpow2.f32 %v845_v5  ;;  %v1892_v9 = vsub.f32 %v1804_v24, %v800_v7  ;;  %v1895_v10 = vsub.f32 %v1802_v22, %v804_v8 }
 0x32b   : > { %1319 = vpow2.f32 %v849_v6 }
 0x32c   : > { %v847_v20 = vmul.f32 1.442695, %v1892_v9  ;;  %v851_v11 = vmul.f32 1.442695, %v1895_v10 }
 0x32d   : > { %v806_v18 = vpop.xlane.xlu0 %805  ;;  %v808_v12 = vpop.xlane.xlu1 %807 }
 0x32e   : > { %1321 = vpow2.f32 %v847_v20  ;;  %v1900_v13 = vsub.f32 %v1808_v28, %v806_v18  ;;  %v1903_v14 = vsub.f32 %v1812_v32, %v808_v12 }
 0x32f   : > { %1323 = vpow2.f32 %v851_v11 }
 0x330   : > { %v853_v24 = vmul.f32 1.442695, %v1900_v13  ;;  %v855_v22 = vmul.f32 1.442695, %v1903_v14 }
 0x331   : > { %v810_v15 = vpop.xlane.xlu0 %809  ;;  %v812_v16 = vpop.xlane.xlu1 %811 }
 0x332   : > { %1325 = vpow2.f32 %v853_v24  ;;  %v1908_v17 = vsub.f32 %v1806_v26, %v810_v15  ;;  %v1911_v19 = vsub.f32 %v1810_v30, %v812_v16 }
 0x333   : > { %1327 = vpow2.f32 %v855_v22 }
 0x334   : > { %v1318_v21 = vpop.eup %1317  ;;  %v857_v28 = vmul.f32 1.442695, %v1908_v17  ;;  %v859_v32 = vmul.f32 1.442695, %v1911_v19 }
 0x335   : > { %877 = vadd.xlane.f32.xlu0 %v1318_v21  ;;  %v814_v23 = vpop.xlane.xlu0 %813  ;;  %v816_v25 = vpop.xlane.xlu1 %815 }
 0x336   : > { %v1320_v27 = vpop.eup %1319  ;;  %1329 = vpow2.f32 %v857_v28  ;;  %v1916_v29 = vsub.f32 %v1816_v36, %v814_v23  ;;  %v1919_v26 = vsub.f32 %v1820_v40, %v816_v25 }
 0x337   : > { %1331 = vpow2.f32 %v859_v32 }
 0x338   : > { %v1322_v31 = vpop.eup %1321  ;;  %v861_v30 = vmul.f32 1.442695, %v1916_v29  ;;  %v863_v33 = vmul.f32 1.442695, %v1919_v26 }
 0x339   : > { %881 = vadd.xlane.f32.xlu0 %v1320_v27  ;;  %879 = vadd.xlane.f32.xlu1 %v1322_v31  ;;  %v818_v35 = vpop.xlane.xlu0 %817  ;;  %v820_v37 = vpop.xlane.xlu1 %819 }
 0x33a   : > { %v1324_v39 = vpop.eup %1323  ;;  %1333 = vpow2.f32 %v861_v30  ;;  %v1924_v41 = vsub.f32 %v1814_v34, %v818_v35  ;;  %v1927_v36 = vsub.f32 %v1818_v38, %v820_v37 }
 0x33b   : > { %1335 = vpow2.f32 %v863_v33 }
 0x33c   : > { %v1326_v40 = vpop.eup %1325  ;;  %v865_v43 = vmul.f32 1.442695, %v1924_v41  ;;  %v867_v45 = vmul.f32 1.442695, %v1927_v36 }
 0x33d   : > { %883 = vadd.xlane.f32.xlu1 %v1324_v39  ;;  %885 = vadd.xlane.f32.xlu0 %v1326_v40  ;;  %v822_v47 = vpop.xlane.xlu0 %821  ;;  %v824_v49 = vpop.xlane.xlu1 %823 }
 0x33e   : > { %v1328_v50 = vpop.eup %1327  ;;  %1337 = vpow2.f32 %v865_v43  ;;  %v1932_v51 = vsub.f32 %v1824_v44, %v822_v47  ;;  %v1935_v34 = vsub.f32 %v1828_v48, %v824_v49 }
 0x33f   : > { %1339 = vpow2.f32 %v867_v45 }
 0x340   : > { %v1330_v38 = vpop.eup %1329  ;;  %v869_v52 = vmul.f32 1.442695, %v1932_v51  ;;  %v871_v53 = vmul.f32 1.442695, %v1935_v34 }
 0x341   : > { %887 = vadd.xlane.f32.xlu1 %v1328_v50  ;;  %889 = vadd.xlane.f32.xlu0 %v1330_v38  ;;  %v826_v54 = vpop.xlane.xlu0 %825  ;;  %v828_v55 = vpop.xlane.xlu1 %827 }
 0x342   : > { %v1332_v56 = vpop.eup %1331  ;;  %1341 = vpow2.f32 %v869_v52  ;;  %v1940_v57 = vsub.f32 %v1822_v42, %v826_v54  ;;  %v1943_v44 = vsub.f32 %v1826_v46, %v828_v55 }
 0x343   : > { %1343 = vpow2.f32 %v871_v53 }
 0x344   : > { %v1334_v48 = vpop.eup %1333  ;;  %v873_v58 = vmul.f32 1.442695, %v1940_v57  ;;  %v875_v59 = vmul.f32 1.442695, %v1943_v44 }
 0x345   : > { %891 = vadd.xlane.f32.xlu1 %v1332_v56  ;;  %893 = vadd.xlane.f32.xlu0 %v1334_v48  ;;  %v1336_v60 = vpop.eup %1335 }
 0x346   : > { %1345 = vpow2.f32 %v873_v58 }
 0x347   : > { %1347 = vpow2.f32 %v875_v59 }
 0x348   : > { %v1338_v61 = vpop.eup %1337 }
 0x349   : > { %895 = vadd.xlane.f32.xlu1 %v1336_v60  ;;  %897 = vadd.xlane.f32.xlu0 %v1338_v61  ;;  %v1340_v62 = vpop.eup %1339 }
 0x34c   : > { %v1342_v42 = vpop.eup %1341 }
 0x34d   : > { %899 = vadd.xlane.f32.xlu1 %v1340_v62  ;;  %901 = vadd.xlane.f32.xlu0 %v1342_v42  ;;  %v1344_v46 = vpop.eup %1343 }
 0x350   : > { %v1346_v63 = vpop.eup %1345 }
 0x351   : > { %903 = vadd.xlane.f32.xlu1 %v1344_v46  ;;  %905 = vadd.xlane.f32.xlu0 %v1346_v63  ;;  %v1348_v0 = vpop.eup %1347 }
 0x355   : > { %907 = vadd.xlane.f32.xlu1 %v1348_v0 }
 0x3c2   : > { %v878_v1 = vpop.xlane.xlu0 %877 }
 0x3c3   : > { %1349 = vlog2.f32 %v878_v1 }
 0x3c6   : > { %v880_v2 = vpop.xlane.xlu1 %879  ;;  %v882_v5 = vpop.xlane.xlu0 %881 }
 0x3c7   : > { %1351 = vlog2.f32 %v880_v2 }
 0x3c8   : > { %1353 = vlog2.f32 %v882_v5 }
 0x3ca   : > { %v884_v6 = vpop.xlane.xlu1 %883  ;;  %v886_v7 = vpop.xlane.xlu0 %885 }
 0x3cb   : > { %1355 = vlog2.f32 %v884_v6 }
 0x3cc   : > { %1357 = vlog2.f32 %v886_v7 }
 0x3cd   : > { %v1350_v8 = vpop.eup %1349 }
 0x3ce   : > { %v910_v20 = vmul.f32 0.6931472, %v1350_v8  ;;  %v888_v11 = vpop.xlane.xlu1 %887  ;;  %v890_v18 = vpop.xlane.xlu0 %889 }
 0x3cf   : > { %1359 = vlog2.f32 %v888_v11 }
 0x3d0   : > { %v941_v12 = vsub.f32 %v1884_v3, %v910_v20  ;;  %1361 = vlog2.f32 %v890_v18 }
 0x3d1   : > { %v1352_v24 = vpop.eup %1351 }
 0x3d2   : > { %v1354_v22 = vpop.eup %1353  ;;  %958 = vst [vmem:[#allocation10] sm:$0xff] %v941_v12  ;;  %v912_v15 = vmul.f32 0.6931472, %v1352_v24  ;;  %v892_v16 = vpop.xlane.xlu1 %891 }
 0x3d3   : > { %v894_v21 = vpop.xlane.xlu0 %893  ;;  %v914_v28 = vmul.f32 0.6931472, %v1354_v22  ;;  %1363 = vlog2.f32 %v892_v16 }
 0x3d4   : > { %v942_v32 = vsub.f32 %v1892_v9, %v912_v15  ;;  %1365 = vlog2.f32 %v894_v21 }
 0x3d5   : > { %v1356_v23 = vpop.eup %1355  ;;  %v943_v25 = vsub.f32 %v1887_v4, %v914_v28 }
 0x3d6   : > { %v1358_v27 = vpop.eup %1357  ;;  %959 = vst [vmem:[#allocation10 + $0x8] sm:$0xff] %v942_v32  ;;  %v916_v31 = vmul.f32 0.6931472, %v1356_v23  ;;  %v896_v30 = vpop.xlane.xlu1 %895 }
 0x3d7   : > { %v898_v3 = vpop.xlane.xlu0 %897  ;;  %960 = vst [vmem:[#allocation10 + $0x10] sm:$0xff] %v943_v25  ;;  %v918_v33 = vmul.f32 0.6931472, %v1358_v27  ;;  %1367 = vlog2.f32 %v896_v30 }
 0x3d8   : > { %v944_v35 = vsub.f32 %v1895_v10, %v916_v31  ;;  %1369 = vlog2.f32 %v898_v3 }
 0x3d9   : > { %v1360_v37 = vpop.eup %1359  ;;  %v945_v39 = vsub.f32 %v1900_v13, %v918_v33 }
 0x3da   : > { %v1362_v40 = vpop.eup %1361  ;;  %961 = vst [vmem:[#allocation10 + $0x18] sm:$0xff] %v944_v35  ;;  %v920_v9 = vmul.f32 0.6931472, %v1360_v37  ;;  %v900_v43 = vpop.xlane.xlu1 %899 }
 0x3db   : > { %v902_v45 = vpop.xlane.xlu0 %901  ;;  %962 = vst [vmem:[#allocation10 + $0x20] sm:$0xff] %v945_v39  ;;  %v922_v4 = vmul.f32 0.6931472, %v1362_v40  ;;  %1371 = vlog2.f32 %v900_v43 }
 0x3dc   : > { %v946_v47 = vsub.f32 %v1903_v14, %v920_v9  ;;  %1373 = vlog2.f32 %v902_v45 }
 0x3dd   : > { %v1364_v49 = vpop.eup %1363  ;;  %v947_v50 = vsub.f32 %v1908_v17, %v922_v4 }
 0x3de   : > { %v1366_v38 = vpop.eup %1365  ;;  %963 = vst [vmem:[#allocation10 + $0x28] sm:$0xff] %v946_v47  ;;  %v924_v10 = vmul.f32 0.6931472, %v1364_v49  ;;  %v904_v52 = vpop.xlane.xlu1 %903 }
 0x3df   : > { %v906_v53 = vpop.xlane.xlu0 %905  ;;  %964 = vst [vmem:[#allocation10 + $0x30] sm:$0xff] %v947_v50  ;;  %v926_v13 = vmul.f32 0.6931472, %v1366_v38  ;;  %1375 = vlog2.f32 %v904_v52 }
 0x3e0   : > { %v948_v54 = vsub.f32 %v1911_v19, %v924_v10  ;;  %1377 = vlog2.f32 %v906_v53 }
 0x3e1   : > { %v1368_v55 = vpop.eup %1367  ;;  %v949_v56 = vsub.f32 %v1916_v29, %v926_v13 }
 0x3e2   : > { %v1370_v48 = vpop.eup %1369  ;;  %965 = vst [vmem:[#allocation10 + $0x38] sm:$0xff] %v948_v54  ;;  %v928_v14 = vmul.f32 0.6931472, %v1368_v55  ;;  %v908_v58 = vpop.xlane.xlu1 %907 }
 0x3e3   : > { %966 = vst [vmem:[#allocation10 + $0x40] sm:$0xff] %v949_v56  ;;  %v930_v17 = vmul.f32 0.6931472, %v1370_v48  ;;  %1379 = vlog2.f32 %v908_v58 }
 0x3e4   : > { %v950_v59 = vsub.f32 %v1919_v26, %v928_v14 }
 0x3e5   : > { %v1372_v60 = vpop.eup %1371  ;;  %v951_v61 = vsub.f32 %v1924_v41, %v930_v17 }
 0x3e6   : > { %v1374_v62 = vpop.eup %1373  ;;  %967 = vst [vmem:[#allocation10 + $0x48] sm:$0xff] %v950_v59  ;;  %v932_v42 = vmul.f32 0.6931472, %v1372_v60 }
 0x3e7   : > { %968 = vst [vmem:[#allocation10 + $0x50] sm:$0xff] %v951_v61  ;;  %v934_v19 = vmul.f32 0.6931472, %v1374_v62 }
 0x3e8   : > { %v952_v46 = vsub.f32 %v1927_v36, %v932_v42 }
 0x3e9   : > { %v1376_v29 = vpop.eup %1375  ;;  %v953_v63 = vsub.f32 %v1932_v51, %v934_v19 }
 0x3ea   : > { %v1378_v0 = vpop.eup %1377  ;;  %969 = vst [vmem:[#allocation10 + $0x58] sm:$0xff] %v952_v46  ;;  %v936_v1 = vmul.f32 0.6931472, %v1376_v29 }
 0x3eb   : > { %970 = vst [vmem:[#allocation10 + $0x60] sm:$0xff] %v953_v63  ;;  %v938_v2 = vmul.f32 0.6931472, %v1378_v0 }
 0x3ec   : > { %v954_v26 = vsub.f32 %v1935_v34, %v936_v1 }
 0x3ed   : > { %v1380_v5 = vpop.eup %1379  ;;  %v955_v41 = vsub.f32 %v1940_v57, %v938_v2 }
 0x3ee   : > { %971 = vst [vmem:[#allocation10 + $0x68] sm:$0xff] %v954_v26  ;;  %v940_v6 = vmul.f32 0.6931472, %v1380_v5 }
 0x3ef   : > { %972 = vst [vmem:[#allocation10 + $0x70] sm:$0xff] %v955_v41 }
 0x3f0   : > { %v956_v7 = vsub.f32 %v1943_v44, %v940_v6 }
 0x3f2   : > { %973 = vst [vmem:[#allocation10 + $0x78] sm:$0xff] %v956_v7 }
 0x3f3 PF: > { %p1242_p2 = scmp.eq.s32.totalorder %s1621_s21, 3  ;;  %s1564_s18 = smov [#allocation10]  }
 0x3f4   : > { %s980_s28 = sshll.u32 %s1564_s18, 4  ;;  %s981_s28 = int_to_ptr.vmem [resolvable:$true] %s980_s28 }
 0x3f5   : > { %s1467_s30 = scalar_lea.vmem %s981_s28, 2048  ;;  %p1474_p5 = scmp.lt.s32.totalorder %s981_s28, %s981_s28 }
 0x3f6   : > { %p1468_p4 = scmp.ne.s32.totalorder %s981_s28, %s1467_s30  ;;  %p1475_p6 = scmp.lt.s32.totalorder %s1467_s30, %s1467_s30 }
 0x3f8   : > { %p1469_p8 = pnand %p1468_p4, %p1242_p2  ;;  %p1476_p9 = por %p1475_p6, %p1474_p5 }
 0x3fa   : > { %p1470_p13 = pneg %p1469_p8 }
 0x3fc   : > { %p1477_p10 = pnand %p1476_p9, %p1470_p13 }
 0x3fe   : > { %1480 = shalt.err (!%p1477_p10)
}
 0x3ff   : > { %s1481_s15 = scalar_lea.hbm %s2008_s4, 2048 }
 0x400   : > { %p1482_p7 = scmp.ne.s32.totalorder %s2008_s4, %s1481_s15  ;;  %p1487_p3 = scmp.lt.u32.totalorder %s1481_s15, %s2008_s4 }
 0x402   : > { %p1483_p11 = pnand %p1482_p7, %p1242_p2 }
 0x404   : > { %p1484_p0 = pneg %p1483_p11 }
 0x406   : > { %p1489_p12 = pnand %p1487_p3, %p1484_p0 }
 0x408   : > { %1492 = shalt.err (!%p1489_p12)
}
 0x409   : > { %s1565_s9 = smov 128   ;;  %s1566_s23 = smov 8  }
 0x40a   : > { %1223 = dma.vmem_to_hbm [thread:$0]  (%p1242_p2), %s981_s28, 2048, %s2008_s4, [#allocation6], %s1565_s9, %s1565_s9, %s1566_s23  }
 0x40b   : > { %1530 = dma.done.wait (%p1242_p2), [#allocation6], 2048  }
 0x40c   : > { %1532 = vsyncadd (%p1242_p2), [#allocation6], 4294965248 }
 0x40d PF: > { %s17_s20 = sadd.s32 1, %s1555_s20   ;;  %s2025_s15 = smov %s1539_s16 }
 0x40e   : > { %p14_p1 = scmp.ge.s32.totalorder %s17_s20, 6   ;;  %s2026_s16 = smov %s1543_s17 }
 0x40f   : > { %s2027_s17 = smov %s1754_s11  ;;  %s2028_s18 = smov %s1551_s19 }
 0x410   : > { %s2029_s19 = smov %s2031_s14  ;;  %16 = sbr.rel (!%p14_p1) target bundleno = 5 (0x5), region = 107 }
 0x417   :  { %996 = vsyncpa [#allocation5], 1 }
 0x418   :  { %998 = vsyncpa [#allocation5 + $0x1], 1 }
 0x419   :  { %999 = vsyncpa [#allocation8], 1 }
 0x41a   :  { %1000 = vsyncpa [#allocation6], 1 }
 0x41b   :  { %1002 = vsyncpa [#allocation6 + $0x1], 1 }

</bundles_post_ra>
